<compile_context>
chip_gen: v5e
topology: v5e:2x2
jax: 0.10.0
libtpu: 0.0.40
codegen_flags: <defaults>
</compile_context>

<pallas_src>
import jax
import jax.numpy as jnp
from jax import lax
from jax.experimental import pallas as pl
from jax.experimental.pallas import tpu as pltpu

# ------------------------- synthetic constants ------------------------------
EDGE_WIDTH = 16                 # EDGE_WIDTH (small for the demo)
ROTATIONS = 6                   # len(ROTATIONS)  (hex rotations)
VISITATION_SCALE = 1.0 / 3.0    # VISITATION_SCALE
EMB_SIZE = 32                   # config.embedding_size
NUM_STATIC_PROPS = 2            # properties embedded by StaticEmbedder
NUM_DYNAMIC_PROPS = 2           # properties embedded by DynamicEmbedder
P_TOTAL = NUM_STATIC_PROPS + NUM_DYNAMIC_PROPS
VOCAB = 8                       # property vocabulary size
TOTAL_VOCAB = P_TOTAL * VOCAB   # merged one-hot width (= 32)
NUM_EXTRAS = 5                  # obstacle, obs_current, obs_memory, leader, follower
S = EDGE_WIDTH * EDGE_WIDTH     # 256 spatial cells on the lane axis

# channel layout of `embedded` (torch.cat order in forward):
#   [embedded_env(E), obstacle(1), obs_current(1), obs_memory(1),
#    previous_visitations(R), all_visitations(1), leader(1), follower(1)]
C_EMBEDDED = EMB_SIZE + 3 + ROTATIONS + 1 + 2
# + environment ones channel (1) + compass (R)  from _add_utility_channels
C_OUT = C_EMBEDDED + 1 + ROTATIONS          # 51
N_TAIL = C_OUT - EMB_SIZE                   # 19 rows assembled in-register


def _cdiv(a, b):
    return -(-a // b)


# ------------------------------ Pallas kernel --------------------------------
def env_embedder_kernel(rot_ref,      # SMEM (Bp,) int32   (scalar prefetch)
                        idx_ref,      # VMEM (TB, P_TOTAL, S) int32 (raw indices)
                        tabT_ref,     # VMEM (E, TOTAL_VOCAB) f32  (merged table^T)
                        extras_ref,   # VMEM (TB, NUM_EXTRAS, S) f32
                        pv_ref,       # VMEM (TB, R, S) f32 (unscaled visitations)
                        out_ref):     # VMEM (TB, C_OUT, S) f32
    tb = out_ref.shape[0]
    gbase = pl.program_id(0) * tb

    # block-resident constants / loop-invariant iotas (hoisted out of the loop)
    tabT = tabT_ref[...]                                              # (E, 4V)
    sub_iota = lax.broadcasted_iota(jnp.int32, (TOTAL_VOCAB, S), 0) % VOCAB
    prow = lax.broadcasted_iota(jnp.int32, (8, ROTATIONS), 0)
    pcol = lax.broadcasted_iota(jnp.int32, (8, ROTATIONS), 1)
    crow = lax.broadcasted_iota(jnp.int32, (ROTATIONS, S), 0)
    ones_row = jnp.ones((1, S), jnp.float32)

    # Short per-element loop (TB <= 8): keeps onehot/emb live set per element
    # small (no batch fused onto the matmul lane axis -> no vreg spills).
    for i in range(tb):
        rot = rot_ref[gbase + i]                  # SMEM scalar read

        idx = idx_ref[i]                          # (P_TOTAL, S) int32
        extras = extras_ref[i]                    # (NUM_EXTRAS, S)
        pv_raw = pv_ref[i]                        # (R, S) unscaled
        obs_mem = extras[2:3]                     # (1, S)

        # ---- fused static+dynamic embedders ---------------------------------
        # single compare against the sublane-replicated indices, then one
        # (E, 4V) @ (4V, S) MXU matmul over the merged table.
        # NOTE: out-of-range indices (>= VOCAB) silently yield a zero embedding.
        rep_idx = jnp.concatenate(
            [jnp.broadcast_to(idx[p:p + 1], (VOCAB, S)) for p in range(P_TOTAL)],
            axis=0)                                                  # (4V, S)
        onehot = (sub_iota == rep_idx).astype(jnp.float32)           # (4V, S)
        emb = jnp.dot(tabT, onehot, preferred_element_type=jnp.float32)  # (E, S)

        # ---- previous visitations: shuffle + all_visitations in one matmul --
        # rows 0..R-1: SCALE * onehot(col == (row - rot) mod R)  (egocentric)
        # row  R     : ones (unscaled)  -> all_visitations
        # row  R+1   : zeros (padding to 8 sublanes)
        src = prow - rot
        src = jnp.where(src < 0, src + ROTATIONS, src)
        sel = (pcol == src).astype(jnp.float32) * VISITATION_SCALE
        pvmat = jnp.where(prow < ROTATIONS, sel,
                          jnp.where(prow == ROTATIONS, 1.0, 0.0))    # (8, R)
        pv_out = jnp.dot(pvmat, pv_raw,
                         preferred_element_type=jnp.float32)         # (8, S)

        # ---- compass one-hot (utility channel, unmasked) ---------------------
        compass = (crow == rot).astype(jnp.float32)                  # (R, S)

        # ---- assemble tail rows 32..50 in-register, single store -------------
        tail = jnp.concatenate(
            [extras[0:3] * obs_mem,                       # obstacle, obs_cur, obs_mem
             pv_out[0:ROTATIONS + 1] * obs_mem,           # pv_shuf (6) + all_visit (1)
             extras[3:5] * obs_mem,                       # leader, follower
             ones_row,                                    # environment ones channel
             compass],                                    # compass one-hot
            axis=0)                                       # (N_TAIL, S)

        out_ref[i, 0:EMB_SIZE, :] = emb * obs_mem         # sublane-aligned store
        out_ref[i, EMB_SIZE:C_OUT, :] = tail              # one boundary store


# ------------------------------ wrapper --------------------------------------
def environment_embedder(rotations, static_idx, dynamic_idx, static_tab,
                         dynamic_tab, obstacles, obs_current, obs_memory,
                         previous_visitations, leader_loc, follower_loc):
    """Returns NCHW (B, C_OUT, EDGE_WIDTH, EDGE_WIDTH) float32."""
    B = rotations.shape[0]

    # ---- batch blocking ------------------------------------------------------
    # >= 2 grid steps whenever B >= 2 (v7x megacore); per-step block capped at
    # 8 elements (VMEM: ~132 KB/elem double-buffered -> ~1 MB at TB=8).
    if B <= 1:
        tb, grid_b = max(B, 1), 1
    else:
        tb = min(_cdiv(B, 2), 8)
        grid_b = _cdiv(B, tb)
    Bp = grid_b * tb

    def pad_b(x):
        if Bp == B:
            return x
        return jnp.pad(x, [(0, Bp - B)] + [(0, 0)] * (x.ndim - 1))

    # raw per-cell property indices, channel-major (B, P_TOTAL, S); the merged
    # vocabulary offset is handled in-kernel (iota % VOCAB), not here.
    idx = pad_b(jnp.concatenate([static_idx, dynamic_idx], axis=1)
                .reshape(B, P_TOTAL, S).astype(jnp.int32))

    # merged embedding table, transposed so the kernel does (E, 4V) @ (4V, S)
    tab = jnp.concatenate([static_tab, dynamic_tab], axis=0)
    tabT = tab.reshape(TOTAL_VOCAB, EMB_SIZE).T                      # (E, 4V)

    extras = pad_b(jnp.stack(
        [obstacles, obs_current, obs_memory, leader_loc, follower_loc],
        axis=1).reshape(B, NUM_EXTRAS, S))
    pv = pad_b(previous_visitations.reshape(B, ROTATIONS, S))        # NCHW already
    rot = pad_b(rotations.astype(jnp.int32))                         # -> SMEM

    grid_spec = pltpu.PrefetchScalarGridSpec(
        num_scalar_prefetch=1,                    # rotations
        grid=(grid_b,),
        in_specs=[
            pl.BlockSpec((tb, P_TOTAL, S), lambda b, r: (b, 0, 0)),
            # constant block index -> fetched once, not re-DMA'd per step
            pl.BlockSpec((EMB_SIZE, TOTAL_VOCAB), lambda b, r: (0, 0)),
            pl.BlockSpec((tb, NUM_EXTRAS, S), lambda b, r: (b, 0, 0)),
            pl.BlockSpec((tb, ROTATIONS, S), lambda b, r: (b, 0, 0)),
        ],
        out_specs=pl.BlockSpec((tb, C_OUT, S), lambda b, r: (b, 0, 0)),
    )

    out = pl.pallas_call(
        env_embedder_kernel,
        out_shape=jax.ShapeDtypeStruct((Bp, C_OUT, S), jnp.float32),
        grid_spec=grid_spec,
        compiler_params=pltpu.CompilerParams(
            dimension_semantics=("parallel",)),   # v7x: shard batch across TCs
    )(rot, idx, tabT, extras, pv)

    # already channel-major / NCHW: drop batch padding, fold S back to (H, W)
    return out[:B].reshape(B, C_OUT, EDGE_WIDTH, EDGE_WIDTH)


# -------------------------- pure-JAX reference -------------------------------
def reference_forward(rotations, static_idx, dynamic_idx, static_tab,
                      dynamic_tab, obstacles, obs_current, obs_memory,
                      previous_visitations, leader_loc, follower_loc):
    B = rotations.shape[0]

    def embed(idx, tab):  # idx (B,P,H,W) int32, tab (P,V,E)
        emb = jnp.zeros((B, EDGE_WIDTH, EDGE_WIDTH, EMB_SIZE), jnp.float32)
        for p in range(idx.shape[1]):
            emb = emb + tab[p][idx[:, p]]
        return emb.transpose(0, 3, 1, 2)                         # (B,E,H,W)

    embedded_env = embed(static_idx, static_tab) + embed(dynamic_idx, dynamic_tab)

    pv_scaled = previous_visitations * VISITATION_SCALE
    j = jnp.arange(ROTATIONS)
    src = (j[None, :] - rotations[:, None]) % ROTATIONS          # (B, R)
    pv_shuf = jnp.take_along_axis(pv_scaled, src[:, :, None, None], axis=1)
    all_visit = jnp.sum(previous_visitations, axis=1, keepdims=True)

    obs_mem = obs_memory[:, None]
    embedded = jnp.concatenate(
        [embedded_env, obstacles[:, None], obs_current[:, None], obs_mem,
         pv_shuf, all_visit, leader_loc[:, None], follower_loc[:, None]], axis=1)
    env_tensor = embedded * obs_mem

    env_channel = jnp.ones((B, 1, EDGE_WIDTH, EDGE_WIDTH), jnp.float32)
    compass = (jnp.arange(ROTATIONS)[None, :, None, None]
               == rotations[:, None, None, None]).astype(jnp.float32)
    compass = jnp.broadcast_to(compass, (B, ROTATIONS, EDGE_WIDTH, EDGE_WIDTH))
    return jnp.concatenate([env_tensor, env_channel, compass], axis=1)


# ------------------------------- main ----------------------------------------
if __name__ == "__main__":
    key = jax.random.PRNGKey(0)
    ks = jax.random.split(key, 12)
    B = 2

    rotations = jax.random.randint(ks[0], (B,), 0, ROTATIONS, dtype=jnp.int32)
    static_idx = jax.random.randint(
        ks[1], (B, NUM_STATIC_PROPS, EDGE_WIDTH, EDGE_WIDTH), 0, VOCAB, jnp.int32)
    dynamic_idx = jax.random.randint(
        ks[2], (B, NUM_DYNAMIC_PROPS, EDGE_WIDTH, EDGE_WIDTH), 0, VOCAB, jnp.int32)
    static_tab = jax.random.normal(ks[3], (NUM_STATIC_PROPS, VOCAB, EMB_SIZE),
                                   jnp.float32)
    dynamic_tab = jax.random.normal(ks[4], (NUM_DYNAMIC_PROPS, VOCAB, EMB_SIZE),
                                    jnp.float32)
    obstacles = jax.random.bernoulli(ks[5], 0.3, (B, EDGE_WIDTH, EDGE_WIDTH)
                                     ).astype(jnp.float32)
    obs_current = jax.random.bernoulli(ks[6], 0.5, (B, EDGE_WIDTH, EDGE_WIDTH)
                                       ).astype(jnp.float32)
    obs_memory = jax.random.bernoulli(ks[7], 0.7, (B, EDGE_WIDTH, EDGE_WIDTH)
                                      ).astype(jnp.float32)
    previous_visitations = jax.random.uniform(
        ks[8], (B, ROTATIONS, EDGE_WIDTH, EDGE_WIDTH), jnp.float32)
    leader_loc = jax.random.bernoulli(ks[9], 0.01, (B, EDGE_WIDTH, EDGE_WIDTH)
                                      ).astype(jnp.float32)
    follower_loc = jax.random.bernoulli(ks[10], 0.01, (B, EDGE_WIDTH, EDGE_WIDTH)
                                        ).astype(jnp.float32)

    args = (rotations, static_idx, dynamic_idx, static_tab, dynamic_tab,
            obstacles, obs_current, obs_memory, previous_visitations,
            leader_loc, follower_loc)

    out = environment_embedder(*args)
    out = jax.block_until_ready(out)

    ref = reference_forward(*args)
    assert out.shape == (B, C_OUT, EDGE_WIDTH, EDGE_WIDTH), out.shape
    assert jnp.allclose(out, ref, atol=1e-5, rtol=1e-5), \
        float(jnp.max(jnp.abs(out - ref)))

    # compass sanity check mirroring the module's assert
    compass_sum = float(jnp.sum(out[:, -ROTATIONS:]))
    assert compass_sum == EDGE_WIDTH * EDGE_WIDTH * B, compass_sum

    print("KERNEL_OK")
</pallas_src>

<mosaic_0001>
module attributes {stable_mosaic.version = 11 : i64} {
  func.func @env_embedder_kernel(%arg0: i32, %arg1: memref<2xi32, #tpu.memory_space<smem>>, %arg2: memref<1x4x256xi32, #tpu.memory_space<vmem>>, %arg3: memref<32x32xf32, #tpu.memory_space<vmem>>, %arg4: memref<1x5x256xf32, #tpu.memory_space<vmem>>, %arg5: memref<1x6x256xf32, #tpu.memory_space<vmem>>, %arg6: memref<1x51x256xf32, #tpu.memory_space<vmem>>) attributes {dimension_semantics = [#tpu.dimension_semantics<parallel>], iteration_bounds = array<i64: 2>, scalar_prefetch = 1 : i64, scratch_operands = 0 : i64, tpu.core_type = #tpu.core_type<tc>, window_params = [{transform_indices = @transform_0, window_bounds = array<i64: 1, 4, 256>}, {pipeline_mode = #tpu.pipeline_mode<synchronous>, transform_indices = @transform_1, window_bounds = array<i64: 32, 32>}, {transform_indices = @transform_2, window_bounds = array<i64: 1, 5, 256>}, {transform_indices = @transform_3, window_bounds = array<i64: 1, 6, 256>}, {transform_indices = @transform_4, window_bounds = array<i64: 1, 51, 256>}]} {
    %c1_i32 = arith.constant 1 : i32
    %0 = arith.muli %arg0, %c1_i32 : i32
    %c0 = arith.constant 0 : index
    %c0_0 = arith.constant 0 : index
    %1 = vector.load %arg3[%c0, %c0_0] : memref<32x32xf32, #tpu.memory_space<vmem>>, vector<32x32xf32>
    %2 = tpu.iota {dimensions = array<i32: 0>} : vector<32x256xi32>
    %c8_i32 = arith.constant 8 : i32
    %c0_i32 = arith.constant 0 : i32
    %3 = arith.cmpi eq, %c8_i32, %c0_i32 : i32
    %c1_i32_1 = arith.constant 1 : i32
    %4 = arith.select %3, %c1_i32_1, %c8_i32 : i32
    %5 = vector.broadcast %4 : i32 to vector<32x256xi32>
    %6 = arith.remsi %2, %5 : vector<32x256xi32>
    %c0_i32_2 = arith.constant 0 : i32
    %7 = vector.broadcast %c0_i32_2 : i32 to vector<32x256xi32>
    %8 = arith.cmpi ne, %6, %7 : vector<32x256xi32>
    %c0_i32_3 = arith.constant 0 : i32
    %9 = vector.broadcast %c0_i32_3 : i32 to vector<32x256xi32>
    %10 = arith.cmpi slt, %6, %9 : vector<32x256xi32>
    %c0_i32_4 = arith.constant 0 : i32
    %11 = arith.cmpi slt, %4, %c0_i32_4 : i32
    %12 = vector.broadcast %11 : i1 to vector<32x256xi1>
    %13 = vector.broadcast %12 : vector<32x256xi1> to vector<32x256xi1>
    %14 = arith.xori %10, %13 : vector<32x256xi1>
    %15 = arith.andi %14, %8 : vector<32x256xi1>
    %16 = vector.broadcast %4 : i32 to vector<32x256xi32>
    %17 = arith.addi %6, %16 : vector<32x256xi32>
    %18 = arith.select %15, %17, %6 : vector<32x256xi1>, vector<32x256xi32>
    %19 = tpu.iota {dimensions = array<i32: 0>} : vector<8x6xi32>
    %20 = tpu.iota {dimensions = array<i32: 1>} : vector<8x6xi32>
    %21 = tpu.iota {dimensions = array<i32: 0>} : vector<6x256xi32>
    %cst = arith.constant 1.000000e+00 : f32
    %22 = vector.broadcast %cst : f32 to vector<1x256xf32>
    %c0_i32_5 = arith.constant 0 : i32
    %23 = arith.addi %0, %c0_i32_5 : i32
    %24 = arith.index_cast %23 : i32 to index
    %25 = memref.load %arg1[%24] : memref<2xi32, #tpu.memory_space<smem>>
    %c0_6 = arith.constant 0 : index
    %c0_7 = arith.constant 0 : index
    %c0_8 = arith.constant 0 : index
    %26 = vector.load %arg2[%c0_6, %c0_7, %c0_8] : memref<1x4x256xi32, #tpu.memory_space<vmem>>, vector<1x4x256xi32>
    %27 = vector.shape_cast %26 : vector<1x4x256xi32> to vector<4x256xi32>
    %c0_9 = arith.constant 0 : index
    %c0_10 = arith.constant 0 : index
    %c0_11 = arith.constant 0 : index
    %28 = vector.load %arg4[%c0_9, %c0_10, %c0_11] : memref<1x5x256xf32, #tpu.memory_space<vmem>>, vector<1x5x256xf32>
    %29 = vector.shape_cast %28 : vector<1x5x256xf32> to vector<5x256xf32>
    %c0_12 = arith.constant 0 : index
    %c0_13 = arith.constant 0 : index
    %c0_14 = arith.constant 0 : index
    %30 = vector.load %arg5[%c0_12, %c0_13, %c0_14] : memref<1x6x256xf32, #tpu.memory_space<vmem>>, vector<1x6x256xf32>
    %31 = vector.shape_cast %30 : vector<1x6x256xf32> to vector<6x256xf32>
    %32 = vector.extract_strided_slice %29 {offsets = [2, 0], sizes = [1, 256], strides = [1, 1]} : vector<5x256xf32> to vector<1x256xf32>
    %33 = vector.extract_strided_slice %27 {offsets = [0, 0], sizes = [1, 256], strides = [1, 1]} : vector<4x256xi32> to vector<1x256xi32>
    %34 = vector.shape_cast %33 : vector<1x256xi32> to vector<1x256xi32>
    %35 = vector.broadcast %34 : vector<1x256xi32> to vector<8x256xi32>
    %36 = vector.extract_strided_slice %27 {offsets = [1, 0], sizes = [1, 256], strides = [1, 1]} : vector<4x256xi32> to vector<1x256xi32>
    %37 = vector.shape_cast %36 : vector<1x256xi32> to vector<1x256xi32>
    %38 = vector.broadcast %37 : vector<1x256xi32> to vector<8x256xi32>
    %39 = vector.extract_strided_slice %27 {offsets = [2, 0], sizes = [1, 256], strides = [1, 1]} : vector<4x256xi32> to vector<1x256xi32>
    %40 = vector.shape_cast %39 : vector<1x256xi32> to vector<1x256xi32>
    %41 = vector.broadcast %40 : vector<1x256xi32> to vector<8x256xi32>
    %42 = vector.extract_strided_slice %27 {offsets = [3, 0], sizes = [1, 256], strides = [1, 1]} : vector<4x256xi32> to vector<1x256xi32>
    %43 = vector.shape_cast %42 : vector<1x256xi32> to vector<1x256xi32>
    %44 = vector.broadcast %43 : vector<1x256xi32> to vector<8x256xi32>
    %45 = tpu.concatenate %35, %38, %41, %44 in 0 : vector<8x256xi32>, vector<8x256xi32>, vector<8x256xi32>, vector<8x256xi32> -> vector<32x256xi32>
    %46 = arith.cmpi eq, %18, %45 : vector<32x256xi32>
    %47 = arith.extui %46 : vector<32x256xi1> to vector<32x256xi32>
    %48 = arith.sitofp %47 : vector<32x256xi32> to vector<32x256xf32>
    %cst_15 = arith.constant dense<0.000000e+00> : vector<32x256xf32>
    %49 = tpu.matmul %1, %48, %cst_15 {dimension_numbers = #tpu.dot_dimension_numbers<[1], [0], [0], [1], [0, 0, 1, 1], [], []>} : vector<32x32xf32>, vector<32x256xf32>, vector<32x256xf32> -> vector<32x256xf32>
    %50 = vector.broadcast %25 : i32 to vector<8x6xi32>
    %51 = arith.subi %19, %50 : vector<8x6xi32>
    %c0_i32_16 = arith.constant 0 : i32
    %52 = vector.broadcast %c0_i32_16 : i32 to vector<8x6xi32>
    %53 = arith.cmpi slt, %51, %52 : vector<8x6xi32>
    %c6_i32 = arith.constant 6 : i32
    %54 = vector.broadcast %c6_i32 : i32 to vector<8x6xi32>
    %55 = arith.addi %51, %54 : vector<8x6xi32>
    %56 = arith.select %53, %55, %51 : vector<8x6xi1>, vector<8x6xi32>
    %57 = arith.cmpi eq, %20, %56 : vector<8x6xi32>
    %58 = arith.extui %57 : vector<8x6xi1> to vector<8x6xi32>
    %59 = arith.sitofp %58 : vector<8x6xi32> to vector<8x6xf32>
    %cst_17 = arith.constant 0.333333343 : f32
    %60 = vector.broadcast %cst_17 : f32 to vector<8x6xf32>
    %61 = arith.mulf %59, %60 : vector<8x6xf32>
    %c6_i32_18 = arith.constant 6 : i32
    %62 = vector.broadcast %c6_i32_18 : i32 to vector<8x6xi32>
    %63 = arith.cmpi slt, %19, %62 : vector<8x6xi32>
    %c6_i32_19 = arith.constant 6 : i32
    %64 = vector.broadcast %c6_i32_19 : i32 to vector<8x6xi32>
    %65 = arith.cmpi eq, %19, %64 : vector<8x6xi32>
    %cst_20 = arith.constant 1.000000e+00 : f32
    %cst_21 = arith.constant 0.000000e+00 : f32
    %66 = vector.broadcast %cst_20 : f32 to vector<8x6xf32>
    %67 = vector.broadcast %cst_21 : f32 to vector<8x6xf32>
    %68 = arith.select %65, %66, %67 : vector<8x6xi1>, vector<8x6xf32>
    %69 = arith.select %63, %61, %68 : vector<8x6xi1>, vector<8x6xf32>
    %cst_22 = arith.constant dense<0.000000e+00> : vector<8x256xf32>
    %70 = tpu.matmul %69, %31, %cst_22 {dimension_numbers = #tpu.dot_dimension_numbers<[1], [0], [0], [1], [0, 0, 1, 1], [], []>} : vector<8x6xf32>, vector<6x256xf32>, vector<8x256xf32> -> vector<8x256xf32>
    %71 = vector.broadcast %25 : i32 to vector<6x256xi32>
    %72 = arith.cmpi eq, %21, %71 : vector<6x256xi32>
    %73 = arith.extui %72 : vector<6x256xi1> to vector<6x256xi32>
    %74 = arith.sitofp %73 : vector<6x256xi32> to vector<6x256xf32>
    %75 = vector.extract_strided_slice %29 {offsets = [0, 0], sizes = [3, 256], strides = [1, 1]} : vector<5x256xf32> to vector<3x256xf32>
    %76 = vector.broadcast %32 : vector<1x256xf32> to vector<3x256xf32>
    %77 = arith.mulf %75, %76 : vector<3x256xf32>
    %78 = vector.extract_strided_slice %70 {offsets = [0, 0], sizes = [7, 256], strides = [1, 1]} : vector<8x256xf32> to vector<7x256xf32>
    %79 = vector.broadcast %32 : vector<1x256xf32> to vector<7x256xf32>
    %80 = arith.mulf %78, %79 : vector<7x256xf32>
    %81 = vector.extract_strided_slice %29 {offsets = [3, 0], sizes = [2, 256], strides = [1, 1]} : vector<5x256xf32> to vector<2x256xf32>
    %82 = vector.broadcast %32 : vector<1x256xf32> to vector<2x256xf32>
    %83 = arith.mulf %81, %82 : vector<2x256xf32>
    %84 = tpu.concatenate %77, %80, %83, %22, %74 in 0 : vector<3x256xf32>, vector<7x256xf32>, vector<2x256xf32>, vector<1x256xf32>, vector<6x256xf32> -> vector<19x256xf32>
    %85 = vector.broadcast %32 : vector<1x256xf32> to vector<32x256xf32>
    %86 = arith.mulf %49, %85 : vector<32x256xf32>
    %c0_23 = arith.constant 0 : index
    %c0_24 = arith.constant 0 : index
    %c0_25 = arith.constant 0 : index
    %87 = vector.load %arg6[%c0_23, %c0_24, %c0_25] : memref<1x51x256xf32, #tpu.memory_space<vmem>>, vector<1x32x256xf32>
    %88 = vector.shape_cast %87 : vector<1x32x256xf32> to vector<32x256xf32>
    %89 = vector.shape_cast %86 : vector<32x256xf32> to vector<1x32x256xf32>
    tpu.vector_store %arg6[%c0_23, %c0_24, %c0_25], %89 {strides = array<i32>} : memref<1x51x256xf32, #tpu.memory_space<vmem>>, vector<1x32x256xf32>,
    %c0_26 = arith.constant 0 : index
    %c32 = arith.constant 32 : index
    %c0_27 = arith.constant 0 : index
    %90 = vector.load %arg6[%c0_26, %c32, %c0_27] : memref<1x51x256xf32, #tpu.memory_space<vmem>>, vector<1x19x256xf32>
    %91 = vector.shape_cast %90 : vector<1x19x256xf32> to vector<19x256xf32>
    %92 = vector.shape_cast %84 : vector<19x256xf32> to vector<1x19x256xf32>
    tpu.vector_store %arg6[%c0_26, %c32, %c0_27], %92 {strides = array<i32>} : memref<1x51x256xf32, #tpu.memory_space<vmem>>, vector<1x19x256xf32>,
    return
  }
  func.func @transform_0(%arg0: i32, %arg1: memref<2xi32, #tpu.memory_space<smem>>) -> (i32, i32, i32) {
    %c0_i32 = arith.constant 0 : i32
    %c0_i32_0 = arith.constant 0 : i32
    %c0_i32_1 = arith.constant 0 : i32
    return %arg0, %c0_i32, %c0_i32_0 : i32, i32, i32
  }
  func.func @transform_1(%arg0: i32, %arg1: memref<2xi32, #tpu.memory_space<smem>>) -> (i32, i32) {
    %c0_i32 = arith.constant 0 : i32
    %c0_i32_0 = arith.constant 0 : i32
    %c0_i32_1 = arith.constant 0 : i32
    return %c0_i32, %c0_i32_0 : i32, i32
  }
  func.func @transform_2(%arg0: i32, %arg1: memref<2xi32, #tpu.memory_space<smem>>) -> (i32, i32, i32) {
    %c0_i32 = arith.constant 0 : i32
    %c0_i32_0 = arith.constant 0 : i32
    %c0_i32_1 = arith.constant 0 : i32
    return %arg0, %c0_i32, %c0_i32_0 : i32, i32, i32
  }
  func.func @transform_3(%arg0: i32, %arg1: memref<2xi32, #tpu.memory_space<smem>>) -> (i32, i32, i32) {
    %c0_i32 = arith.constant 0 : i32
    %c0_i32_0 = arith.constant 0 : i32
    %c0_i32_1 = arith.constant 0 : i32
    return %arg0, %c0_i32, %c0_i32_0 : i32, i32, i32
  }
  func.func @transform_4(%arg0: i32, %arg1: memref<2xi32, #tpu.memory_space<smem>>) -> (i32, i32, i32) {
    %c0_i32 = arith.constant 0 : i32
    %c0_i32_0 = arith.constant 0 : i32
    %c0_i32_1 = arith.constant 0 : i32
    return %arg0, %c0_i32, %c0_i32_0 : i32, i32, i32
  }
}

</mosaic_0001>

<bundles_post_ra>
// kernel: tpu_custom_call.1
= control target key start
LH: loop header
LB: loop body
LE: loop exit
PB: predicated region body
PF: predicated region fallthrough
CT: control target
= control target key end

     0   :  { %s713_s21 = smov [#allocation3]   ;;  %s884_s0 = inlined_call_operand.vmem [shape: s32[2], index: 0, kind: input, shape index: {}]   ;;  %s885_s1 = inlined_call_operand.vmem [shape: s32[2,4,256], index: 1, kind: input, shape index: {}]   ;;  %s886_s2 = inlined_call_operand.vmem [shape: f32[32,32], index: 2, kind: input, shape index: {}]   ;;  %s887_s3 = inlined_call_operand.vmem [shape: f32[2,5,256], index: 3, kind: input, shape index: {}]   ;;  %s888_s4 = inlined_call_operand.vmem [shape: f32[2,6,256], index: 4, kind: input, shape index: {}]   ;;  %s889_s5 = inlined_call_operand.vmem [shape: f32[2,51,256], index: 5, kind: output, shape index: {}]  }
   0x1   :  { %s11_s20 = sshll.u32 %s884_s0, 4  ;;  %s12_s20 = int_to_ptr.vmem [resolvable:$true] %s11_s20 }
   0x2   :  { %14 = dma.vmem_to_smem %s12_s20, 16, %s713_s21, [#allocation2] }
   0x3   :  { %707 = dma.done.wait [#allocation2], 16 }
   0x4   :  { %708 = vsyncadd [#allocation2], 4294967280 }
   0x5   :  { %17 = sfence }
   0x6   :  { %s749_s22 = smov 0  }
   0x7 LB: > { %s624_s23 = sadd.s32 4294967295, %s711_s22   ;;  %p628_p0 = scmp.ge.s32.totalorder %s711_s22, 1  ;;  %s711_s22 = sphi %s749_s22, %s23_s22  }
   0x8   : > { %p191_p1 = scmp.lt.s32.totalorder %s711_s22, 3 }
   0xa   : > { %p192_p2 = pnand %p628_p0, %p191_p1 }
   0xb   : > { %p227_p3 = scmp.lt.s32.totalorder (!%p192_p2), %s624_s23, 1  ;;  %s768_s28 = sld [smem:[#allocation3 + %s624_s23]] (!%p192_p2) }
   0xc   : > { %195 = sbr.rel (%p192_p2) target bundleno = 185 (0xb9), region = 36 }
  0x11   : > { %v251_v0 = vlaneseq  ;;  %s757_s0 = scalar_select %p227_p3, %s624_s23, 1  ;;  %v714_v28 = vmov 1.0   ;;  %v423_v31 = vstv %s768_s28  ;;  %v715_v36 = vmov 0.0   ;;  %v250_v38 = vld [vmem:[%s886_s2 + $0x18] sm:$0xff]  ;;  %v247_v44 = vld [vmem:[%s886_s2] sm:$0xff]  ;;  %v248_v49 = vld [vmem:[%s886_s2 + $0x8] sm:$0xff] }
  0x12   : > { %vm352_vm9 = vcmask 261120   ;;  %vm440_vm11 = vcmask 1045504   ;;  %vm436_vm15 = vcmask 48128   ;;  %v249_v50 = vld [vmem:[%s886_s2 + $0x10] sm:$0xff] }
  0x13   : > { %v759_v1 = vshrl.u32 %v251_v0, 7  ;;  %s668_s24 = sshll.u32 %s757_s0, 3  ;;  %s669_s29 = sshll.u32 %s757_s0, 4  ;;  %v305_v35 = vand.u32 127, %v251_v0 }
  0x14   : > { %s231_s27 = scalar_lea.vmem %s885_s1, %s668_s24  ;;  %s679_s30 = smul.u32 112, %s757_s0 }
  0x15   : > { %v255_v2 = vadd.s32 24, %v759_v1  ;;  %v254_v3 = vadd.s32 16, %v759_v1  ;;  %v253_v4 = vadd.s32 8, %v759_v1  ;;  %v307_v6 = vld [vmem:[%s231_s27] sm:$0xff]  ;;  %v260_v9 = vand.u32 7, %v759_v1  ;;  %s241_s8 = scalar_lea.vmem %s888_s4, %s669_s29  ;;  %s236_s23 = scalar_lea.vmem %s887_s3, %s669_s29 }
  0x16   : > { %v324_v10 = vperm.slane %v307_v6, 3  ;;  %v325_v11 = vperm.slane %v307_v6, 7  ;;  %v320_v12 = vperm.slane %v307_v6, 2  ;;  %v321_v13 = vperm.slane %v307_v6, 6  ;;  %s825_s13 = scalar_lea.vmem %s889_s5, %s679_s30  ;;  %v310_v41 = vld [vmem:[%s241_s8] sm:$0x3f] }
  0x17   : > { %v281_v5 = vand.u32 7, %v255_v2  ;;  %v274_v7 = vand.u32 7, %v254_v3  ;;  %v267_v8 = vand.u32 7, %v253_v4  ;;  %v316_v14 = vperm.slane %v307_v6, 1  ;;  %v311_v42 = vld [vmem:[%s241_s8 + $0x8] sm:$0x3f] }
  0x18   : > { %v317_v15 = vperm.slane %v307_v6, 5  ;;  %v312_v16 = vperm.slane %v307_v6, 0  ;;  %v313_v17 = vperm.slane %v307_v6, 4  ;;  %v326_v18 = vperm.slane %v324_v10, 3  ;;  %v308_v51 = vld [vmem:[%s236_s23] sm:$0x1f] }
  0x19   : > { %v327_v19 = vperm.slane %v325_v11, 3  ;;  %v322_v20 = vperm.slane %v320_v12, 2  ;;  %v323_v21 = vperm.slane %v321_v13, 2  ;;  %v318_v22 = vperm.slane %v316_v14, 1  ;;  %v309_v52 = vld [vmem:[%s236_s23 + $0x8] sm:$0x1f] }
  0x1a   : > { %v319_v23 = vperm.slane %v317_v15, 1  ;;  %v314_v24 = vperm.slane %v312_v16, 0  ;;  %v315_v25 = vperm.slane %v313_v17, 0  ;;  %vm334_vm0 = vcmp.eq.s32.totalorder %v281_v5, %v326_v18 }
  0x1b   : > { %vm335_vm1 = vcmp.eq.s32.totalorder %v281_v5, %v327_v19  ;;  %vm771_vm2 = vcmp.eq.s32.totalorder %v274_v7, %v322_v20  ;;  %vm775_vm3 = vcmp.eq.s32.totalorder %v274_v7, %v323_v21  ;;  %671 = vmatpush.msk.msra.mxu2 %vm334_vm0, %v714_v28  ;;  %644 = vmatpush.msk.msra.mxu0 %vm334_vm0, %v714_v28  ;;  %vm433_vm12 = vcmp.eq.s32.totalorder %v759_v1, 6 }
  0x1c   : > { %675 = vmatpush.msk.msra.mxu3 %vm335_vm1, %v714_v28  ;;  %652 = vmatpush.msk.msra.mxu1 %vm335_vm1, %v714_v28  ;;  %vm781_vm4 = vcmp.eq.s32.totalorder %v267_v8, %v318_v22  ;;  %vm785_vm5 = vcmp.eq.s32.totalorder %v267_v8, %v319_v23  ;;  %v424_v32 = vsub.s32 %v759_v1, %v423_v31  ;;  %vm432_vm14 = vcmp.lt.s32.totalorder %v759_v1, 6 }
  0x1d   : > { %672 = vmatpush.msk.msra.mxu2 %vm771_vm2, %v714_v28  ;;  %vm487_vm6 = vcmp.eq.s32.totalorder %v759_v1, %v423_v31  ;;  %645 = vmatpush.msk.msra.mxu0 %vm771_vm2, %v714_v28  ;;  %vm805_vm7 = vcmp.eq.s32.totalorder %v260_v9, %v314_v24  ;;  %vm809_vm8 = vcmp.eq.s32.totalorder %v260_v9, %v315_v25  ;;  %v434_v47 = vsel %vm433_vm12, 1.0, %v715_v36 }
  0x1e   : > { %676 = vmatpush.msk.msra.mxu3 %vm775_vm3, %v714_v28  ;;  %653 = vmatpush.msk.msra.mxu1 %vm775_vm3, %v714_v28  ;;  %v665_v37 = vsel %vm487_vm6, 1.0, %v715_v36  ;;  %vm425_vm10 = vcmp.lt.s32.totalorder %v424_v32, 0  ;;  %v426_v39 = vadd.s32 6, %v424_v32  ;;  %v490_v53 = vperm.slane %v308_v51, 2 }
  0x1f   : > { %673 = vmatpush.msk.msra.mxu2 %vm781_vm4, %v714_v28  ;;  %v820_v40 = vrot.slane %v665_v37, 3  ;;  %646 = vmatpush.msk.msra.mxu0 %vm781_vm4, %v714_v28  ;;  %v491_v54 = vperm.slane %v309_v52, 2  ;;  %vm511_vm0 = vcmask 1042432   ;;  %vm514_vm1 = vcmask 1041408  }
  0x20   : > { %677 = vmatpush.msk.msra.mxu3 %vm785_vm5, %v714_v28  ;;  %654 = vmatpush.msk.msra.mxu1 %vm785_vm5, %v714_v28  ;;  %v427_v43 = vsel %vm425_vm10, %v426_v39, %v424_v32  ;;  %v492_v63 = vmul.f32 %v490_v53, %v308_v51  ;;  %vm517_vm2 = vcmask 1043456   ;;  %vm520_vm3 = vcmask 1044480  }
  0x21   : > { %674 = vmatpush.msk.msra.mxu2 %vm805_vm7, %v714_v28  ;;  %543 = vst [vmem:[%s825_s13 + $0x60] sm:$0x7] %v820_v40  ;;  %vm428_vm13 = vcmp.eq.s32.totalorder %v305_v35, %v427_v43  ;;  %647 = vmatpush.msk.msra.mxu0 %vm805_vm7, %v714_v28  ;;  %v493_v0 = vmul.f32 %v491_v54, %v309_v52 }
  0x22   : > { %678 = vmatpush.msk.msra.mxu3 %vm809_vm8, %v714_v28  ;;  %651 = vmatmul.msk.f32.vlgmr.msra.gmra.mxu2 %vm352_vm9, %v250_v38  ;;  %544 = vst [vmem:[%s825_s13 + $0x68] sm:$0x7] %v820_v40  ;;  %v660_v45 = vsel %vm428_vm13, 1.0, %v715_v36  ;;  %v504_v7 = vrot.slane %v492_v63, 1 }
  0x23   : > { %659 = vmatmul.msk.f32.vlgmr.msra.gmra.mxu3 %vm352_vm9, %v250_v38  ;;  %661 = vmatpush.msk.msrb.mxu2 %vm440_vm11, %v310_v41  ;;  %v431_v46 = vmul.f32 0.33333334, %v660_v45  ;;  %v505_v8 = vrot.slane %v493_v0, 1 }
  0x24   : > { %663 = vmatpush.msk.msrb.mxu3 %vm440_vm11, %v311_v42  ;;  %655 = vmatpush.msk.msra.mxu1 %vm809_vm8, %v714_v28 }
  0x25   : > { %648 = vmatmul.msk.f32.vlgmr.msra.gmra.mxu0 %vm352_vm9, %v247_v44  ;;  %656 = vmatmul.msk.f32.vlgmr.msra.gmra.mxu1 %vm352_vm9, %v247_v44  ;;  %v435_v48 = vsel %vm432_vm14, %v431_v46, %v434_v47 }
  0x2a   : > { %662 = vmatmul.msk.f32.vlgmr.msrb.gmra.mxu2 %vm436_vm15, %v435_v48 }
  0x2b   : > { %664 = vmatmul.msk.f32.vlgmr.msrb.gmra.mxu3 %vm436_vm15, %v435_v48 }
  0x2d   : > { %649 = vmatmul.msk.f32.gmra.mxu0 %vm352_vm9, %v248_v49  ;;  %657 = vmatmul.msk.f32.gmra.mxu1 %vm352_vm9, %v248_v49 }
  0x35   : > { %650 = vmatmul.msk.f32.gmra.mxu0 %vm352_vm9, %v249_v50  ;;  %658 = vmatmul.msk.f32.gmra.mxu1 %vm352_vm9, %v249_v50 }
  0xa2   : > { %v382_v55 = vpop.f32.mrf.mxu0  ;;  %v411_v56 = vpop.f32.mrf.mxu1 }
  0xa3   : > { %v523_v57 = vmul.f32 %v490_v53, %v382_v55  ;;  %v524_v58 = vmul.f32 %v491_v54, %v411_v56 }
  0xa5   : > { %531 = vst [vmem:[%s825_s13] sm:$0xff] %v523_v57  ;;  %v391_v59 = vpop.f32.mrf.mxu2 }
  0xa6   : > { %v420_v60 = vpop.f32.mrf.mxu3  ;;  %532 = vst [vmem:[%s825_s13 + $0x8] sm:$0xff] %v524_v58  ;;  %v529_v61 = vmul.f32 %v490_v53, %v391_v59 }
  0xa7   : > { %v530_v62 = vmul.f32 %v491_v54, %v420_v60 }
  0xa8   : > { %537 = vst [vmem:[%s825_s13 + $0x30] sm:$0xff] %v529_v61 }
  0xa9   : > { %538 = vst [vmem:[%s825_s13 + $0x38] sm:$0xff] %v530_v62 }
  0xaa   : > { %v385_v1 = vpop.f32.mrf.mxu0  ;;  %v414_v2 = vpop.f32.mrf.mxu1 }
  0xab   : > { %v525_v3 = vmul.f32 %v490_v53, %v385_v1  ;;  %v526_v4 = vmul.f32 %v491_v54, %v414_v2 }
  0xad   : > { %533 = vst [vmem:[%s825_s13 + $0x10] sm:$0xff] %v525_v3  ;;  %v464_v5 = vpop.f32.mrf.mxu2 }
  0xae   : > { %v484_v6 = vpop.f32.mrf.mxu3  ;;  %534 = vst [vmem:[%s825_s13 + $0x18] sm:$0xff] %v526_v4  ;;  %v494_v9 = vmul.f32 %v490_v53, %v464_v5 }
  0xaf   : > { %v495_v10 = vmul.f32 %v491_v54, %v484_v6 }
  0xb0   : > { %v498_v11 = vrot.slane %v494_v9, 5 }
  0xb1   : > { %v499_v12 = vrot.slane %v495_v10, 5 }
  0xb2   : > { %v512_v13 = vsel %vm511_vm0, %v492_v63, %v498_v11  ;;  %v515_v14 = vsel %vm514_vm1, %v498_v11, %v504_v7  ;;  %v388_v17 = vpop.f32.mrf.mxu0  ;;  %v417_v18 = vpop.f32.mrf.mxu1 }
  0xb3   : > { %v513_v15 = vsel %vm511_vm0, %v493_v0, %v499_v12  ;;  %v516_v16 = vsel %vm514_vm1, %v499_v12, %v505_v8  ;;  %v518_v19 = vsel %vm517_vm2, %v515_v14, 1.0  ;;  %539 = vst [vmem:[%s825_s13 + $0x40] sm:$0xff] %v512_v13  ;;  %v527_v21 = vmul.f32 %v490_v53, %v388_v17 }
  0xb4   : > { %v519_v20 = vsel %vm517_vm2, %v516_v16, 1.0  ;;  %v521_v22 = vsel %vm520_vm3, %v518_v19, %v820_v40  ;;  %540 = vst [vmem:[%s825_s13 + $0x48] sm:$0xff] %v513_v15  ;;  %v528_v24 = vmul.f32 %v491_v54, %v417_v18 }
  0xb5   : > { %v522_v23 = vsel %vm520_vm3, %v519_v20, %v820_v40  ;;  %541 = vst [vmem:[%s825_s13 + $0x50] sm:$0xff] %v521_v22 }
  0xb6   : > { %542 = vst [vmem:[%s825_s13 + $0x58] sm:$0xff] %v522_v23 }
  0xb7   : > { %535 = vst [vmem:[%s825_s13 + $0x20] sm:$0xff] %v527_v21 }
  0xb8   : > { %536 = vst [vmem:[%s825_s13 + $0x28] sm:$0xff] %v528_v24 }
  0xb9 PF: > { %s23_s22 = sadd.s32 1, %s711_s22  }
  0xba   : > { %p20_p4 = scmp.ge.s32.totalorder %s23_s22, 4  }
  0xbc   :  { %22 = sbr.rel (!%p20_p4) target bundleno = 7 (0x7), region = 72 }

</bundles_post_ra>
